<compile_context>
chip_gen: v6e
topology: v6e:2x2x1
jax: 0.10.0
libtpu: 0.0.40
codegen_flags: <defaults>
</compile_context>

<pallas_src>
import jax
import jax.numpy as jnp
from jax.experimental import pallas as pl
from jax.experimental.pallas import tpu as pltpu

LANE = 128
# Widest-first lane-dense widths, used only for 0-D / 1-D inputs where a 2-D
# view is layout-free anyway; wider slabs -> fewer, longer unmasked vst bursts.
_WIDTH_CANDIDATES = (32768, 16384, 8192, 4096, 2048, 1024, 512, 256, 128)
# ~4 MiB per block buffer; in + out, each double-buffered => ~16 MiB pipelined
# VMEM.  Fits every generation (v7x 64 MiB physical is the tightest) while
# halving per-grid-step overhead vs. 2 MiB blocks on v7x-class HBM bandwidth.
_TARGET_BLOCK_BYTES = 4 * 1024 * 1024
_VMEM_LIMIT_BYTES = 40 * 1024 * 1024


def _neg_kernel(x_ref, o_ref):
    o_ref[...] = -x_ref[...]


def _packed_sublanes(dtype) -> int:
    # Sub-32-bit dtypes pack along sublanes: 8 for 4-byte, 16 for 2-byte,
    # 32 for 1-byte dtypes.
    itemsize = jnp.dtype(dtype).itemsize
    return max(8, 32 // max(itemsize, 1))


def _choose_tile_rows(rows: int, cols: int, itemsize: int, sublane: int) -> int:
    """Row tile: ~_TARGET_BLOCK_BYTES per buffer, sublane-aligned, >=2 grid steps
    whenever there is enough work to split (so v7x's two TensorCores both run)."""
    row_bytes = max(cols * itemsize, 1)
    target_rows = max(
        sublane, (_TARGET_BLOCK_BYTES // row_bytes) // sublane * sublane
    )
    if rows > target_rows:
        return target_rows  # grid already has >= 2 steps
    if rows > 2 * sublane:
        # Whole slab fits one target block -> split in two so the parallel grid
        # axis actually shards across v7x's two TensorCores.
        half = pl.cdiv(rows, 2)
        half = pl.cdiv(half, sublane) * sublane
        return min(rows, half)
    return rows  # tiny input: single full-extent block (always layout-legal)


def _neg_2d(x2d: jax.Array, tile_rows: int, donate: bool) -> jax.Array:
    rows, cols = x2d.shape
    grid = (pl.cdiv(rows, tile_rows),)
    extra = {"input_output_aliases": {0: 0}} if donate else {}
    return pl.pallas_call(
        _neg_kernel,
        out_shape=jax.ShapeDtypeStruct((rows, cols), x2d.dtype),
        grid=grid,
        in_specs=[pl.BlockSpec((tile_rows, cols), lambda i: (i, 0))],
        out_specs=pl.BlockSpec((tile_rows, cols), lambda i: (i, 0)),
        compiler_params=pltpu.CompilerParams(
            dimension_semantics=("parallel",),
            vmem_limit_bytes=_VMEM_LIMIT_BYTES,
        ),
        **extra,
    )(x2d)


def neg_pallas(x: jax.Array, donate: bool = False) -> jax.Array:
    """Elementwise negation (forward of PyTorch `Neg`) as a Pallas TPU kernel.

    Set donate=True (and donate x at the jit boundary) to reuse x's HBM buffer
    for the output via input_output_aliases.
    """
    orig_shape = x.shape
    dtype = x.dtype
    n = x.size
    if n == 0:
        return x

    itemsize = jnp.dtype(dtype).itemsize
    sublane = _packed_sublanes(dtype)

    if x.ndim >= 2:
        # Collapse leading dims only: layout-free (no relayout copy) whenever
        # shape[-2] is a multiple of the sublane pack.  Keeping the original
        # last dim as the lane dim is always layout-legal (block lane extent
        # equals the full array dim), so ragged last dims need no pad/slice.
        cols = orig_shape[-1]
        rows = n // cols
    else:
        # 0-D / 1-D: any 2-D view is equally layout-free; pick the widest
        # lane-dense width that divides n, else a single full-extent row.
        cols = None
        for c in _WIDTH_CANDIDATES:
            if n % c == 0:
                cols = c
                break
        if cols is None:
            cols = n  # full-extent lane dim (legal for any size); tiny inputs only
        rows = n // cols

    tile_rows = _choose_tile_rows(rows, cols, itemsize, sublane)
    out2d = _neg_2d(x.reshape(rows, cols), tile_rows, donate)
    return out2d.reshape(orig_shape)


if __name__ == "__main__":
    key = jax.random.PRNGKey(0)
    k1, k2, k3 = jax.random.split(key, 3)

    # Primary example consistent with the module: small NCHW-like input.
    # Last dim (16) is not lane-aligned -> full-extent lane block, 2 row tiles.
    x = jax.random.normal(key, (2, 4, 16, 16), dtype=jnp.float32)
    y = neg_pallas(x)
    jax.block_until_ready(y)
    assert y.shape == x.shape and y.dtype == x.dtype
    assert jnp.array_equal(y, -x), "mismatch vs reference -x (f32 NCHW)"

    # Ragged bf16 input -> single full-extent block, no pad/slice passes.
    xb = jax.random.normal(k1, (3, 5, 7), dtype=jnp.bfloat16)
    yb = neg_pallas(xb)
    jax.block_until_ready(yb)
    assert yb.shape == xb.shape and yb.dtype == xb.dtype
    assert jnp.array_equal(yb, -xb), "mismatch vs reference -x (bf16 ragged)"

    # Larger lane-aligned input -> layout-free leading-dim collapse,
    # multi-step parallel grid (>= 2 steps for v7x's two TensorCores).
    xl = jax.random.normal(k2, (2, 512, 1024), dtype=jnp.float32)
    yl = neg_pallas(xl)
    jax.block_until_ready(yl)
    assert jnp.array_equal(yl, -xl), "mismatch vs reference -x (large)"

    # 1-D input with n not a multiple of 128 -> full-extent single-row block.
    x1 = jax.random.normal(k3, (1000,), dtype=jnp.float32)
    y1 = neg_pallas(x1)
    jax.block_until_ready(y1)
    assert jnp.array_equal(y1, -x1), "mismatch vs reference -x (1D ragged)"

    print("KERNEL_OK")
</pallas_src>

<mosaic_0001>
module attributes {stable_mosaic.version = 11 : i64} {
  func.func @_neg_kernel(%arg0: i32, %arg1: memref<64x16xf32, #tpu.memory_space<vmem>>, %arg2: memref<64x16xf32, #tpu.memory_space<vmem>>) attributes {dimension_semantics = [#tpu.dimension_semantics<parallel>], iteration_bounds = array<i64: 2>, scalar_prefetch = 0 : i64, scratch_operands = 0 : i64, tpu.core_type = #tpu.core_type<tc>, window_params = [{transform_indices = @transform_0, window_bounds = array<i64: 64, 16>}, {transform_indices = @transform_1, window_bounds = array<i64: 64, 16>}]} {
    %c0 = arith.constant 0 : index
    %c0_0 = arith.constant 0 : index
    %0 = vector.load %arg1[%c0, %c0_0] : memref<64x16xf32, #tpu.memory_space<vmem>>, vector<64x16xf32>
    %cst = arith.constant 0.000000e+00 : f32
    %1 = vector.broadcast %cst : f32 to vector<64x16xf32>
    %2 = arith.subf %1, %0 : vector<64x16xf32>
    %c0_1 = arith.constant 0 : index
    %c0_2 = arith.constant 0 : index
    %3 = vector.load %arg2[%c0_1, %c0_2] : memref<64x16xf32, #tpu.memory_space<vmem>>, vector<64x16xf32>
    tpu.vector_store %arg2[%c0_1, %c0_2], %2 {strides = array<i32>} : memref<64x16xf32, #tpu.memory_space<vmem>>, vector<64x16xf32>,
    return
  }
  func.func @transform_0(%arg0: i32) -> (i32, i32) {
    %c0_i32 = arith.constant 0 : i32
    %c0_i32_0 = arith.constant 0 : i32
    return %arg0, %c0_i32 : i32, i32
  }
  func.func @transform_1(%arg0: i32) -> (i32, i32) {
    %c0_i32 = arith.constant 0 : i32
    %c0_i32_0 = arith.constant 0 : i32
    return %arg0, %c0_i32 : i32, i32
  }
}

</mosaic_0001>

<bundles_post_ra>
// kernel: tpu_custom_call.1
= control target key start
LH: loop header
LB: loop body
LE: loop exit
PB: predicated region body
PF: predicated region fallthrough
CT: control target
= control target key end

     0   :  { %s238_s6 = smov 0   ;;  %s263_s0 = inlined_call_operand.vmem [shape: f32[128,16], index: 0, kind: input, shape index: {}]   ;;  %s264_s1 = inlined_call_operand.vmem [shape: f32[128,16], index: 1, kind: output, shape index: {}]  }
   0x1 LB: > { %s201_s7 = sadd.s32 4294967295, %s226_s6   ;;  %p205_p0 = scmp.ge.s32.totalorder %s226_s6, 1  ;;  %s226_s6 = sphi %s238_s6, %s11_s6  }
   0x2   : > { %p88_p1 = scmp.lt.s32.totalorder %s226_s6, 3 }
   0x4   : > { %p89_p2 = pnand %p205_p0, %p88_p1 }
   0x5   : > { %s206_s8 = sshll.u32 (!%p89_p2), %s201_s7, 3 }
   0x6   : > { %92 = sbr.rel (%p89_p2) target bundleno = 21 (0x15), region = 24  ;;  %p109_p3 = scmp.lt.s32.totalorder (!%p89_p2), %s206_s8, 15 }
   0xb   : > { %s266_s8 = smov (!%p109_p3, %s206_s8), 15  ;;  %vm136_vm0 = vcmask 130048  }
   0xc   : > { %s207_s9 = sshll.u32 %s266_s8, 3 }
   0xd   : > { %s112_s12 = scalar_lea.vmem %s263_s0, %s207_s9  ;;  %s118_s15 = scalar_lea.vmem %s264_s1, %s207_s9 }
   0xe   : > { %v120_v0 = vld [vmem:[%s112_s12] sm:$0xff]  ;;  %v121_v1 = vld [vmem:[%s112_s12 + $0x8] sm:$0xff]  ;;  %v122_v2 = vld [vmem:[%s112_s12 + $0x10] sm:$0xff] }
   0xf   : > { %v128_v3 = vsub.f32 0.0, %v120_v0  ;;  %v129_v4 = vsub.f32 0.0, %v121_v1  ;;  %v130_v5 = vsub.f32 0.0, %v122_v2  ;;  %v123_v6 = vld [vmem:[%s112_s12 + $0x18] sm:$0xff]  ;;  %v124_v7 = vld [vmem:[%s112_s12 + $0x20] sm:$0xff]  ;;  %v125_v8 = vld [vmem:[%s112_s12 + $0x28] sm:$0xff] }
  0x10   : > { %v131_v9 = vsub.f32 0.0, %v123_v6  ;;  %v132_v10 = vsub.f32 0.0, %v124_v7  ;;  %v133_v11 = vsub.f32 0.0, %v125_v8  ;;  %v126_v12 = vld [vmem:[%s112_s12 + $0x30] sm:$0xff]  ;;  %v127_v13 = vld [vmem:[%s112_s12 + $0x38] sm:$0xff] }
  0x11   : > { %137 = vst.msk [vmem:[%s118_s15] sm:$0xff] %vm136_vm0, %v128_v3  ;;  %138 = vst.msk [vmem:[%s118_s15 + $0x8] sm:$0xff] %vm136_vm0, %v129_v4  ;;  %v134_v14 = vsub.f32 0.0, %v126_v12  ;;  %v135_v15 = vsub.f32 0.0, %v127_v13 }
  0x12   : > { %139 = vst.msk [vmem:[%s118_s15 + $0x10] sm:$0xff] %vm136_vm0, %v130_v5  ;;  %140 = vst.msk [vmem:[%s118_s15 + $0x18] sm:$0xff] %vm136_vm0, %v131_v9 }
  0x13   : > { %141 = vst.msk [vmem:[%s118_s15 + $0x20] sm:$0xff] %vm136_vm0, %v132_v10  ;;  %142 = vst.msk [vmem:[%s118_s15 + $0x28] sm:$0xff] %vm136_vm0, %v133_v11 }
  0x14   : > { %143 = vst.msk [vmem:[%s118_s15 + $0x30] sm:$0xff] %vm136_vm0, %v134_v14  ;;  %144 = vst.msk [vmem:[%s118_s15 + $0x38] sm:$0xff] %vm136_vm0, %v135_v15 }
  0x15 PF: > { %s11_s6 = sadd.s32 1, %s226_s6  }
  0x16   : > { %p8_p4 = scmp.ge.s32.totalorder %s11_s6, 4  }
  0x18   :  { %10 = sbr.rel (!%p8_p4) target bundleno = 1 (0x1), region = 54 }

</bundles_post_ra>
